<compile_context>
chip_gen: v7x
topology: tpu7x:2x2x1
jax: 0.10.0
libtpu: 0.0.40
codegen_flags: <defaults>
</compile_context>

<pallas_src>
import jax
import jax.numpy as jnp
import numpy as np
from jax.experimental import pallas as pl
from jax.experimental.pallas import tpu as pltpu


def _dma_copy_kernel(x_ref, o_ref, sem):
    # Single contiguous HBM->HBM DMA over the whole array (both refs live in
    # pl.ANY, i.e. are left in HBM; nothing is staged through VMEM).
    cp = pltpu.make_async_copy(x_ref, o_ref, sem)
    cp.start()
    cp.wait()


@jax.jit
def _pallas_identity_jit(x):
    return pl.pallas_call(
        _dma_copy_kernel,
        out_shape=jax.ShapeDtypeStruct(x.shape, x.dtype),
        # Both operands stay in HBM; the kernel body drives the copy itself,
        # so there is no BlockSpec tiling, no pipeline, no VMEM residency.
        in_specs=[pl.BlockSpec(memory_space=pl.ANY)],
        out_specs=pl.BlockSpec(memory_space=pl.ANY),
        scratch_shapes=[pltpu.SemaphoreType.DMA(())],
    )(x)


def _pallas_identity(x):
    """Identity (pass-through copy) of `x` via a single Pallas HBM->HBM DMA."""
    if x.size == 0:
        return x
    return _pallas_identity_jit(x)


class SimpleNN:
    """JAX/Pallas mirror of the PyTorch SimpleNN module (no parameters)."""

    def __init__(self, debug_identity_copy=False):
        # The original nn.Module defines no parameters and its forward body is
        # `return`.  The identity kernel is launched only when explicitly
        # requested — its result would be dead inside forward(), so launching
        # it there would be pure overhead.
        self._debug_identity_copy = debug_identity_copy

    def forward(self, x):
        # Match PyTorch semantics exactly: forward returns None, no compute.
        if self._debug_identity_copy:
            jax.block_until_ready(_pallas_identity(x))
        return None

    def __call__(self, x):
        return self.forward(x)


if __name__ == "__main__":
    key = jax.random.PRNGKey(0)
    # NCHW-style input consistent with a small conv-net style module.
    x = jax.random.normal(key, (2, 4, 16, 16), dtype=jnp.float32)
    x_host = np.asarray(jax.device_get(x))

    # Exercise the Pallas identity DMA kernel directly; verify bit-exactness.
    y = jax.block_until_ready(_pallas_identity(x))
    assert y.shape == x.shape and y.dtype == x.dtype
    assert np.array_equal(np.asarray(jax.device_get(y)), x_host), \
        "identity kernel mismatch"

    # Also exercise a non-(8,128)-aligned shape: the DMA path needs no padding.
    x_odd = jax.random.normal(jax.random.PRNGKey(1), (3, 5, 7), dtype=jnp.float32)
    y_odd = jax.block_until_ready(_pallas_identity(x_odd))
    assert y_odd.shape == x_odd.shape and y_odd.dtype == x_odd.dtype
    assert np.array_equal(np.asarray(jax.device_get(y_odd)),
                          np.asarray(jax.device_get(x_odd))), \
        "odd-shape identity mismatch"

    # Module-level call: must return None, exactly like the PyTorch forward,
    # and launches no device work.
    model = SimpleNN()
    result = model(x)
    assert result is None

    print("KERNEL_OK")
</pallas_src>

<mosaic_0001>
module attributes {stable_mosaic.version = 11 : i64} {
  func.func @_dma_copy_kernel(%arg0: memref<2x4x16x16xf32, #tpu.memory_space<any>>, %arg1: memref<2x4x16x16xf32, #tpu.memory_space<any>>, %arg2: memref<!tpu.dma_semaphore, #tpu.memory_space<semaphore_mem>>) attributes {dimension_semantics = [], scalar_prefetch = 0 : i64, scratch_operands = 1 : i64, tpu.core_type = #tpu.core_type<tc>} {
    tpu.enqueue_dma source(%arg0 : memref<2x4x16x16xf32, #tpu.memory_space<any>>) target(%arg1 : memref<2x4x16x16xf32, #tpu.memory_space<any>>) target_semaphore(%arg2 : memref<!tpu.dma_semaphore, #tpu.memory_space<semaphore_mem>>)
    tpu.wait_dma2 semaphore(%arg2 : memref<!tpu.dma_semaphore, #tpu.memory_space<semaphore_mem>>) src(%arg0 : memref<2x4x16x16xf32, #tpu.memory_space<any>>) dst(%arg1 : memref<2x4x16x16xf32, #tpu.memory_space<any>>)
    return
  }
}

</mosaic_0001>

<bundles_post_ra>
// kernel: _pallas_identity_jit.1
= control target key start
LH: loop header
LB: loop body
LE: loop exit
PB: predicated region body
PF: predicated region fallthrough
CT: control target
= control target key end

     0   :  { %s36_s6 = smov [#allocation2]   ;;  %s37_s7 = smov [#allocation3]   ;;  %s55_s0 = inlined_call_operand.hbm [shape: f32[2,4,16,16], index: 0, kind: input, shape index: {}]   ;;  %s56_s1 = inlined_call_operand.hbm [shape: f32[2,4,16,16], index: 1, kind: output, shape index: {}]  }
   0x1   :  { %s38_s8 = smov 0  }
   0x2   :  { %18 = dma.general %s55_s0, 2048, %s56_s1, %s36_s6, %s37_s7, [#allocation4], %s38_s8, 0  }
   0x3   :  { %34 = dma.done.wait [#allocation2], 2048 }
   0x4   :  { %35 = vsyncadd [#allocation2], 4294965248 }
   0x5   :  { %24 = vsyncmov [#allocation2] }
   0x8   :  { %s25_s13 = vpop.sfrf %24 }
   0x9   :  { %p30_p0 = scmp.ne.s32.totalorder %s25_s13, 0 }
   0xb   :  { %29 = shalt.err (%p30_p0)  }

</bundles_post_ra>
